<compile_context>
chip_gen: v7x
topology: tpu7x:2x2x1
jax: 0.10.0
libtpu: 0.0.40
codegen_flags: <defaults>
</compile_context>

<pallas_src>
import functools
import math

import jax
import jax.numpy as jnp
from jax import lax
from jax.experimental import pallas as pl
from jax.experimental.pallas import tpu as pltpu


# ---------------------------------------------------------------------------
# Projection kernel: y[b, t, :] = x[b, t, :] @ w      (bias-free nn.Linear)
# ---------------------------------------------------------------------------
def _linear_kernel(precision, x_ref, w_ref, o_ref):
    o_ref[0] = jnp.dot(
        x_ref[0], w_ref[...],
        preferred_element_type=jnp.float32,
        precision=precision,
    ).astype(o_ref.dtype)


def _linear(x, w, *, precision, block_t=256, block_n=512):
    """x: (B, T, C), w: (C, N) -> (B, T, N), tiled over T and N (C kept whole)."""
    B, T, C = x.shape
    C2, N = w.shape
    assert C2 == C
    bt = T if T <= block_t else block_t
    assert T % bt == 0
    bn = N if N <= block_n else block_n
    assert N % bn == 0 and (bn == N or bn % 128 == 0)

    kernel = functools.partial(_linear_kernel, precision)
    return pl.pallas_call(
        kernel,
        out_shape=jax.ShapeDtypeStruct((B, T, N), x.dtype),
        grid_spec=pltpu.PrefetchScalarGridSpec(
            num_scalar_prefetch=0,
            grid=(B, N // bn, T // bt),          # weight block constant over inner T sweep
            in_specs=[
                pl.BlockSpec((1, bt, C), lambda b, ni, ti: (b, ti, 0)),
                pl.BlockSpec((C, bn), lambda b, ni, ti: (0, ni)),
            ],
            out_specs=pl.BlockSpec((1, bt, bn), lambda b, ni, ti: (b, ti, ni)),
        ),
        compiler_params=pltpu.CompilerParams(
            dimension_semantics=("parallel", "parallel", "parallel")),
        cost_estimate=pl.CostEstimate(
            flops=2 * B * T * C * N,
            transcendentals=0,
            bytes_accessed=(x.size + w.size + B * T * N) * x.dtype.itemsize,
        ),
    )(x, w)


# ---------------------------------------------------------------------------
# Flash-style causal attention over pre-projected, head-grouped Q and [K|V]
# ---------------------------------------------------------------------------
def _attn_kernel(G, H, bq, bkv, precision,
                 q_ref, kv_ref, o_ref, m_scr, l_scr, acc_scr):
    """One (batch, head-group, q-tile, kv-tile) step."""
    qi = pl.program_id(2)
    ki = pl.program_id(3)
    nk = pl.num_programs(3)
    GH = G * H
    NEG = jnp.float32(-1e30)   # finite sentinel: avoids -inf - -inf NaNs

    @pl.when(ki == 0)
    def _init():
        m_scr[...] = jnp.full_like(m_scr, NEG)
        l_scr[...] = jnp.zeros_like(l_scr)
        acc_scr[...] = jnp.zeros_like(acc_scr)

    q_first = qi * bq
    q_last = q_first + (bq - 1)
    k_first = ki * bkv
    k_last = k_first + (bkv - 1)

    fully_visible = k_last <= q_first                       # below diagonal: no mask needed
    straddles = jnp.logical_and(k_first <= q_last,
                                jnp.logical_not(fully_visible))
    # tiles with k_first > q_last are fully masked and skipped entirely

    def process(masked):
        q = q_ref[0]       # (bq, G*H)   (1/sqrt(H) already folded into Wq)
        kv = kv_ref[0]     # (bkv, 2*G*H) = [K of group | V of group]
        if masked:
            row = q_first + lax.broadcasted_iota(jnp.int32, (bq, bkv), 0)
            col = k_first + lax.broadcasted_iota(jnp.int32, (bq, bkv), 1)
            allowed = col <= row
        # Static per-head lane slices (G is small); scores contract the H axis directly
        # so no explicit k transpose / XLU traffic is needed.
        for g in range(G):
            qg = q[:, g * H:(g + 1) * H]                    # (bq, H)
            kg = kv[:, g * H:(g + 1) * H]                   # (bkv, H)
            vg = kv[:, GH + g * H:GH + (g + 1) * H]         # (bkv, H)
            s = lax.dot_general(qg, kg, (((1,), (1,)), ((), ())),
                                preferred_element_type=jnp.float32,
                                precision=precision)        # (bq, bkv)
            if masked:
                s = jnp.where(allowed, s, NEG)
            m_prev = m_scr[g]
            m_new = jnp.maximum(m_prev, jnp.max(s, axis=-1, keepdims=True))
            alpha = jnp.exp(m_prev - m_new)
            p = jnp.exp(s - m_new)
            l_scr[g] = alpha * l_scr[g] + jnp.sum(p, axis=-1, keepdims=True)
            acc_scr[g] = alpha * acc_scr[g] + jnp.dot(
                p.astype(vg.dtype), vg,
                preferred_element_type=jnp.float32, precision=precision)
            m_scr[g] = m_new

    @pl.when(fully_visible)
    def _unmasked():
        process(masked=False)

    @pl.when(straddles)
    def _masked():
        process(masked=True)

    @pl.when(ki == nk - 1)
    def _finalize():
        outs = [acc_scr[g] / l_scr[g] for g in range(G)]    # exact normalization
        # Single lane-dense store of the whole (bq, G*H) head-group slab.
        o_ref[0] = jnp.concatenate(outs, axis=-1).astype(o_ref.dtype)


def _pick_group(NH, H):
    """Smallest divisor G of NH giving a lane-dense (multiple-of-128) G*H block,
    else all heads (block then equals the full lane extent, which is also legal)."""
    for G in range(1, NH + 1):
        if NH % G == 0 and (G * H) % 128 == 0:
            return G
    return NH


def multi_head_attention(x, wq, wk, wv, *, heads_per_step=None,
                         block_q=None, block_kv=None, use_bf16=False,
                         vmem_limit_bytes=None):
    """x: (B, T, C); wq/wk/wv: (NH, C, H) (already-transposed nn.Linear weights).

    Returns (B, T, NH*H) = torch.cat([Head_h(x) for h in range(NH)], dim=-1).
    NH = 1 reproduces the single PyTorch Head module exactly.
    """
    B, T, C = x.shape
    NH, C2, H = wq.shape
    assert C2 == C and wk.shape == wq.shape and wv.shape == wq.shape
    scale = float(H) ** -0.5

    G = _pick_group(NH, H) if heads_per_step is None else heads_per_step
    assert NH % G == 0 and (G == NH or (G * H) % 128 == 0)
    NG = NH // G
    GH = G * H

    bq = (T if T <= 256 else 256) if block_q is None else block_q
    bkv = (T if T <= 256 else 256) if block_kv is None else block_kv
    assert T % bq == 0 and T % bkv == 0

    in_dtype = jnp.bfloat16 if use_bf16 else x.dtype
    precision = None if use_bf16 else lax.Precision.HIGHEST

    # ---- fuse + regroup per-head weights on the host (f32 math, then cast) ----
    # Q: fold 1/sqrt(H) in; head h lives at lanes [h*H:(h+1)*H].
    wq_full = jnp.transpose(wq.astype(jnp.float32) * scale, (1, 0, 2)).reshape(C, NH * H)

    def _grp(w):  # (NH, C, H) -> (NG, C, G*H); head hg*G+g at lanes [g*H:(g+1)*H]
        return w.astype(jnp.float32).reshape(NG, G, C, H).transpose(0, 2, 1, 3).reshape(NG, C, GH)

    # [K|V]: group hg occupies lanes [hg*2GH:(hg+1)*2GH] = [K of group | V of group].
    wkv_full = jnp.transpose(jnp.concatenate([_grp(wk), _grp(wv)], axis=-1),
                             (1, 0, 2)).reshape(C, NG * 2 * GH)

    x_c = x.astype(in_dtype)
    # ---- projections: ONE pass over x per fused weight (hoisted out of the attention grid) ----
    q_proj = _linear(x_c, wq_full.astype(in_dtype), precision=precision)     # (B, T, NH*H)
    kv_proj = _linear(x_c, wkv_full.astype(in_dtype), precision=precision)   # (B, T, 2*NH*H)

    itemsize = jnp.dtype(in_dtype).itemsize
    kernel = functools.partial(_attn_kernel, G, H, bq, bkv, precision)

    return pl.pallas_call(
        kernel,
        out_shape=jax.ShapeDtypeStruct((B, T, NH * H), x.dtype),
        grid_spec=pltpu.PrefetchScalarGridSpec(
            num_scalar_prefetch=0,
            grid=(B, NG, T // bq, T // bkv),
            in_specs=[
                pl.BlockSpec((1, bq, GH), lambda b, hg, qi, ki: (b, qi, hg)),       # Q group
                pl.BlockSpec((1, bkv, 2 * GH), lambda b, hg, qi, ki: (b, ki, hg)),  # [K|V] group
            ],
            out_specs=pl.BlockSpec((1, bq, GH), lambda b, hg, qi, ki: (b, qi, hg)),
            scratch_shapes=[
                pltpu.VMEM((G, bq, 1), jnp.float32),   # running max
                pltpu.VMEM((G, bq, 1), jnp.float32),   # running denominator
                pltpu.VMEM((G, bq, H), jnp.float32),   # output accumulator
            ],
        ),
        compiler_params=pltpu.CompilerParams(
            dimension_semantics=("parallel", "parallel", "parallel", "arbitrary"),
            vmem_limit_bytes=vmem_limit_bytes,
        ),
        cost_estimate=pl.CostEstimate(
            flops=4 * B * NH * T * T * H,
            transcendentals=B * NH * T * T,
            bytes_accessed=(q_proj.size + kv_proj.size) * itemsize + B * T * NH * H * 4,
        ),
    )(q_proj, kv_proj)


def head_forward(x, key_weight, query_weight, value_weight, **kwargs):
    """Exact PyTorch `Head` forward: weights are nn.Linear-style (head_size, embedding_dim)."""
    wq = jnp.transpose(query_weight)[None]   # (1, C, H)
    wk = jnp.transpose(key_weight)[None]
    wv = jnp.transpose(value_weight)[None]
    return multi_head_attention(x, wq, wk, wv, **kwargs)


def _reference(x, wq, wk, wv):
    """Pure-JAX port of Head.forward per head (heads concatenated), highest precision."""
    B, T, C = x.shape
    NH, _, H = wq.shape
    scale = float(H) ** -0.5
    mask = jnp.tril(jnp.ones((T, T), dtype=bool))
    outs = []
    for h in range(NH):
        q = jnp.einsum("btc,ch->bth", x, wq[h], precision="highest")
        k = jnp.einsum("btc,ch->bth", x, wk[h], precision="highest")
        v = jnp.einsum("btc,ch->bth", x, wv[h], precision="highest")
        s = jnp.einsum("bth,bsh->bts", q, k, precision="highest") * scale
        s = jnp.where(mask, s, -jnp.inf)
        p = jax.nn.softmax(s, axis=-1)
        outs.append(jnp.einsum("bts,bsh->bth", p, v, precision="highest"))
    return jnp.concatenate(outs, axis=-1)


if __name__ == "__main__":
    key = jax.random.PRNGKey(0)
    kx, kq, kk, kv, kx2 = jax.random.split(key, 5)

    # --- case 1: the exact single-Head module (head_size=16, embedding_dim=32, context=8)
    B, T, C, H = 2, 8, 32, 16
    lim = 1.0 / math.sqrt(C)
    x = jax.random.normal(kx, (B, T, C), dtype=jnp.float32)
    w_key = jax.random.uniform(kk, (H, C), jnp.float32, -lim, lim)     # nn.Linear layout (out, in)
    w_query = jax.random.uniform(kq, (H, C), jnp.float32, -lim, lim)
    w_value = jax.random.uniform(kv, (H, C), jnp.float32, -lim, lim)

    out1 = jax.block_until_ready(head_forward(x, w_key, w_query, w_value))
    ref1 = _reference(x, w_query.T[None], w_key.T[None], w_value.T[None])
    assert out1.shape == (B, T, H)
    assert jnp.allclose(out1, ref1, atol=2e-4, rtol=2e-4), "single-head f32 mismatch"

    # --- case 2: multi-head + multiple KV tiles (flash path: skip / unmasked / masked tiles)
    NH2, H2, C2, T2 = 4, 16, 64, 16
    lim2 = 1.0 / math.sqrt(C2)
    kq2, kk2, kv2 = jax.random.split(kq, 3)
    x2 = jax.random.normal(kx2, (B, T2, C2), dtype=jnp.float32)
    wq2 = jax.random.uniform(kq2, (NH2, C2, H2), jnp.float32, -lim2, lim2)
    wk2 = jax.random.uniform(kk2, (NH2, C2, H2), jnp.float32, -lim2, lim2)
    wv2 = jax.random.uniform(kv2, (NH2, C2, H2), jnp.float32, -lim2, lim2)

    out2 = jax.block_until_ready(
        multi_head_attention(x2, wq2, wk2, wv2, block_q=8, block_kv=8))
    ref2 = _reference(x2, wq2, wk2, wv2)
    assert out2.shape == (B, T2, NH2 * H2)
    assert jnp.allclose(out2, ref2, atol=2e-4, rtol=2e-4), "tiled multi-head f32 mismatch"

    # --- case 3: bf16 MXU inputs (f32 accumulation + f32 softmax), looser tolerance
    out3 = jax.block_until_ready(
        multi_head_attention(x2, wq2, wk2, wv2, block_q=8, block_kv=8, use_bf16=True))
    assert jnp.allclose(out3, ref2, atol=5e-2, rtol=5e-2), "bf16 mismatch"

    print("KERNEL_OK")
</pallas_src>

<mosaic_0001>
module attributes {stable_mosaic.version = 11 : i64} {
  func.func @_linear_kernel(%arg0: i32, %arg1: i32, %arg2: i32, %arg3: memref<1x8x32xf32, #tpu.memory_space<vmem>>, %arg4: memref<32x16xf32, #tpu.memory_space<vmem>>, %arg5: memref<1x8x16xf32, #tpu.memory_space<vmem>>) attributes {dimension_semantics = [#tpu.dimension_semantics<parallel>, #tpu.dimension_semantics<parallel>, #tpu.dimension_semantics<parallel>], iteration_bounds = array<i64: 2, 1, 1>, scalar_prefetch = 0 : i64, scratch_operands = 0 : i64, tpu.core_type = #tpu.core_type<tc>, window_params = [{transform_indices = @transform_0, window_bounds = array<i64: 1, 8, 32>}, {transform_indices = @transform_1, window_bounds = array<i64: 32, 16>}, {transform_indices = @transform_2, window_bounds = array<i64: 1, 8, 16>}]} {
    %c0 = arith.constant 0 : index
    %c0_0 = arith.constant 0 : index
    %c0_1 = arith.constant 0 : index
    %0 = vector.load %arg3[%c0, %c0_0, %c0_1] : memref<1x8x32xf32, #tpu.memory_space<vmem>>, vector<1x8x32xf32>
    %1 = vector.shape_cast %0 : vector<1x8x32xf32> to vector<8x32xf32>
    %c0_2 = arith.constant 0 : index
    %c0_3 = arith.constant 0 : index
    %2 = vector.load %arg4[%c0_2, %c0_3] : memref<32x16xf32, #tpu.memory_space<vmem>>, vector<32x16xf32>
    %cst = arith.constant dense<0.000000e+00> : vector<8x16xf32>
    %3 = tpu.matmul %1, %2, %cst {dimension_numbers = #tpu.dot_dimension_numbers<[1], [0], [0], [1], [0, 0, 1, 1], [], []>, precision = #tpu.contract_precision<fp32>} : vector<8x32xf32>, vector<32x16xf32>, vector<8x16xf32> -> vector<8x16xf32>
    %c0_4 = arith.constant 0 : index
    %c0_5 = arith.constant 0 : index
    %c0_6 = arith.constant 0 : index
    %4 = vector.load %arg5[%c0_4, %c0_5, %c0_6] : memref<1x8x16xf32, #tpu.memory_space<vmem>>, vector<1x8x16xf32>
    %5 = vector.shape_cast %4 : vector<1x8x16xf32> to vector<8x16xf32>
    %6 = vector.shape_cast %3 : vector<8x16xf32> to vector<1x8x16xf32>
    tpu.vector_store %arg5[%c0_4, %c0_5, %c0_6], %6 {strides = array<i32>} : memref<1x8x16xf32, #tpu.memory_space<vmem>>, vector<1x8x16xf32>,
    return
  }
  func.func @transform_0(%arg0: i32, %arg1: i32, %arg2: i32) -> (i32, i32, i32) {
    %c0_i32 = arith.constant 0 : i32
    %c0_i32_0 = arith.constant 0 : i32
    return %arg0, %arg2, %c0_i32 : i32, i32, i32
  }
  func.func @transform_1(%arg0: i32, %arg1: i32, %arg2: i32) -> (i32, i32) {
    %c0_i32 = arith.constant 0 : i32
    %c0_i32_0 = arith.constant 0 : i32
    return %c0_i32, %arg1 : i32, i32
  }
  func.func @transform_2(%arg0: i32, %arg1: i32, %arg2: i32) -> (i32, i32, i32) {
    %c0_i32 = arith.constant 0 : i32
    return %arg0, %arg2, %arg1 : i32, i32, i32
  }
}

</mosaic_0001>

<bundles_post_ra>
// kernel: tpu_custom_call.1
= control target key start
LH: loop header
LB: loop body
LE: loop exit
PB: predicated region body
PF: predicated region fallthrough
CT: control target
= control target key end

     0   :  { %7 = vsyncpa [#allocation3], 0  ;;  %s1250_s0 = inlined_call_operand.vmem [shape: f32[2,8,32], index: 0, kind: input, shape index: {}]   ;;  %s1251_s1 = inlined_call_operand.vmem [shape: f32[32,16], index: 1, kind: input, shape index: {}]   ;;  %s1252_s2 = inlined_call_operand.hbm [shape: f32[2,8,16], index: 2, kind: output, shape index: {}]  }
   0x1   :  { %9 = vsyncpa [#allocation3 + $0x1], 0  ;;  %s1102_s9 = smov 0   ;;  %s1104_s10 = smov 0  }
   0x2   :  { %s1106_s11 = smov 0   ;;  %s1108_s12 = smov 0  }
   0x3   :  { %s1110_s13 = smov 0   ;;  %s1112_s14 = smov 0  }
   0x4 LB: > { %s792_s15 = sadd.s32 4294967295, %s1081_s14   ;;  %s793_s16 = sadd.s32 4294967294, %s1081_s14   ;;  %s1081_s14 = sphi %s1112_s14, %s15_s14   ;;  %s1077_s13 = sphi %s1110_s13, %s1259_s13   ;;  %s1073_s12 = sphi %s1108_s12, %s1258_s12   ;;  %s1069_s11 = sphi %s1106_s11, %s1257_s11   ;;  %s1065_s10 = sphi %s1104_s10, %s1256_s10   ;;  %s1061_s9 = sphi %s1102_s9, %s1255_s9  }
   0x5   : > { %s34_s17 = sadd.s32 1, %s1077_s13  ;;  %s99_s18 = sadd.s32 1, %s1069_s11 }
   0x6   : > { %p36_p0 = scmp.ge.s32.totalorder %s34_s17, 2  ;;  %p109_p1 = scmp.ne.s32.totalorder %s1069_s11, %s1065_s10 }
   0x7   : > { %p110_p2 = scmp.eq.s32.totalorder %s792_s15, 1  ;;  %p115_p3 = scmp.ne.s32.totalorder %s1065_s10, %s1061_s9 }
   0x8   : > { %s1261_s17 = smov (%p36_p0, %s34_s17), 0  ;;  %p116_p5 = scmp.eq.s32.totalorder %s793_s16, 1 }
   0x9   : > { %p1142_p4 = por %p110_p2, %p109_p1  ;;  %s92_s20 = ssub.s32 %s1077_s13, %s1261_s17 }
   0xa   : > { %p797_p6 = scmp.ge.s32.totalorder %s1081_s14, 1  ;;  %p97_p7 = scmp.eq.s32.totalorder %s92_s20, 0 }
   0xb   : > { %p1149_p8 = por %p116_p5, %p115_p3  ;;  %p151_p9 = scmp.lt.s32.totalorder %s1081_s14, 3 }
   0xc   : > { %s1155_s22 = scalar_select %p97_p7, %s1069_s11, %s99_s18  }
   0xd   : > { %p152_p10 = pnand %p797_p6, %p151_p9 }
   0xe   : > { %v191_v0 = vld [vmem:[%s1251_s1] sm:$0xff] (!%p152_p10)  ;;  %v192_v1 = vld [vmem:[%s1251_s1 + $0x8] sm:$0xff] (!%p152_p10)  ;;  %v193_v2 = vld [vmem:[%s1251_s1 + $0x10] sm:$0xff] (!%p152_p10)  ;;  %v1083_v3 = vmov (!%p152_p10), 0.0|0.0   ;;  %p179_p11 = scmp.lt.s32.totalorder (!%p152_p10), %s1073_s12, 1  ;;  %vm1084_vm0 = vmmov (!%p152_p10), 0  }
   0xf   : > { %155 = sbr.rel (%p152_p10) target bundleno = 282 (0x11a), region = 28  ;;  %918 = vmatprep.subr.bf16.mxu0 (!%p152_p10), %v1083_v3  ;;  %v200_v4 = vand.u32 (!%p152_p10), 4294901760, %v191_v0  ;;  %v203_v5 = vand.u32 (!%p152_p10), 4294901760, %v192_v1  ;;  %900 = vmatprep.subr.bf16.mxu1 (!%p152_p10), %v1083_v3  ;;  %v194_v6 = vld [vmem:[%s1251_s1 + $0x18] sm:$0xff] (!%p152_p10)  ;;  %v206_v7 = vand.u32 (!%p152_p10), 4294901760, %v193_v2  ;;  %v1085_v9 = vmov (!%p152_p10), 0.0  }
  0x10   : > { %v209_v8 = vand.u32 (!%p152_p10), 4294901760, %v194_v6  ;;  %875 = vmatprep.mubr.msk.f32.mxu0 (!%p152_p10), %vm1084_vm0, %v1085_v9  ;;  %842 = vmatprep.mubr.msk.f32.mxu1 (!%p152_p10), %vm1084_vm0, %v1085_v9  ;;  %vm195_vm1 = vcmask (!%p152_p10), 261120   ;;  %s176_s8 = sand.u32 (!%p152_p10), 1, %s1065_s10   ;;  %s801_s16 = sshll.u32 (!%p152_p10), %s1073_s12, 7  ;;  %vm684_vm2 = vcmask (!%p152_p10), 130048  }
  0x11   : > { %v901_v10 = vpack.c.bf16 (!%p152_p10), %v203_v5, %v200_v4  ;;  %v280_v11 = vsub.f32 (!%p152_p10), %v191_v0, %v200_v4  ;;  %v287_v12 = vsub.f32 (!%p152_p10), %v192_v1, %v203_v5  ;;  %v294_v13 = vsub.f32 (!%p152_p10), %v193_v2, %v206_v7  ;;  %s798_s15 = sshll.u32 (!%p152_p10), %s176_s8, 3  ;;  %s1203_s25 = scalar_lea.hbm (!%p152_p10), %s1252_s2, %s801_s16 }
  0x12   : > { %v301_v14 = vsub.f32 (!%p152_p10), %v194_v6, %v209_v8  ;;  %v904_v15 = vpack.c.bf16 (!%p152_p10), %v209_v8, %v206_v7  ;;  %s178_s18 = scalar_lea.vmem (!%p152_p10), [#allocation2], %s798_s15  ;;  %s687_s26 = scalar_lea.sflag (!%p152_p10), [#allocation3], %s176_s8 }
  0x13   : > { %920 = vmatpush3.bf16.msra.mxu0 (!%p152_p10), %v901_v10  ;;  %902 = vmatpush3.bf16.msra.mxu1 (!%p152_p10), %v901_v10  ;;  %v281_v16 = vand.u32 (!%p152_p10), 4294901760, %v280_v11  ;;  %v288_v17 = vand.u32 (!%p152_p10), 4294901760, %v287_v12  ;;  %v295_v19 = vand.u32 (!%p152_p10), 4294901760, %v294_v13  ;;  %v913_v39 = vpack.c.bf16 (!%p152_p10), %v287_v12, %v280_v11  ;;  %s702_s20 = sshll.u32 (!%p152_p10), %s178_s18, 4  ;;  %s1205_s20 = int_to_ptr.vmem [resolvable:$true] %s702_s20 }
  0x14   : > { %921 = vmatprep.subr.bf16.mxu0 (!%p152_p10), %v1083_v3  ;;  %903 = vmatprep.subr.bf16.mxu1 (!%p152_p10), %v1083_v3  ;;  %v302_v23 = vand.u32 (!%p152_p10), 4294901760, %v301_v14  ;;  %v916_v40 = vpack.c.bf16 (!%p152_p10), %v301_v14, %v294_v13  ;;  %s1003_s27 = scalar_lea.vmem (!%p152_p10), %s1205_s20, 128 }
  0x15   : > { %v282_v21 = vsub.f32 (!%p152_p10), %v280_v11, %v281_v16  ;;  %v289_v22 = vsub.f32 (!%p152_p10), %v287_v12, %v288_v17  ;;  %v925_v26 = vpack.c.bf16 (!%p152_p10), %v288_v17, %v281_v16  ;;  %v296_v29 = vsub.f32 (!%p152_p10), %v294_v13, %v295_v19  ;;  %p1004_p12 = scmp.ne.s32.totalorder (!%p152_p10), %s1205_s20, %s1003_s27 }
  0x16   : > { %s180_s3 = scalar_select %p179_p11, %s1073_s12, 1  ;;  %v303_v30 = vsub.f32 %v301_v14, %v302_v23  ;;  %v928_v34 = vpack.c.bf16 %v302_v23, %v295_v19 }
  0x17   : > { %923 = vmatpush3.bf16.msra.mxu0 %v904_v15  ;;  %905 = vmatpush3.bf16.msra.mxu1 %v904_v15  ;;  %v283_v27 = vand.u32 4294901760, %v282_v21  ;;  %v290_v28 = vand.u32 4294901760, %v289_v22  ;;  %v297_v35 = vand.u32 4294901760, %v296_v29  ;;  %p1005_p13 = pnand %p1004_p12, %p1142_p4  ;;  %s1086_s12 = smov [#allocation2]  }
  0x18   : > { %s799_s4 = sshll.u32 %s180_s3, 3  ;;  %924 = vmatprep.subr.bf16.mxu0 %v1083_v3  ;;  %906 = vmatprep.subr.bf16.mxu1 %v1083_v3  ;;  %v304_v36 = vand.u32 4294901760, %v303_v30  ;;  %s1007_s28 = sshll.u32 %s1086_s12, 4  ;;  %s1008_s28 = int_to_ptr.vmem [resolvable:$false] %s1007_s28 }
  0x19   : > { %s185_s7 = scalar_lea.vmem %s1250_s0, %s799_s4  ;;  %v907_v33 = vpack.c.bf16 %v290_v28, %v283_v27  ;;  %p1006_p0 = pneg %p1005_p13 }
  0x1a   : > { %v190_v18 = vld [vmem:[%s185_s7] sm:$0xff]  ;;  %v910_v38 = vpack.c.bf16 %v304_v36, %v297_v35  ;;  %s1009_s29 = scalar_lea.vmem %s1008_s28, 256  ;;  %p1010_p1 = scmp.lt.s32.totalorder %s1205_s20, %s1008_s28 }
  0x1b   : > { %v197_v20 = vsel %vm195_vm1, %v190_v18, 0  ;;  %p1011_p2 = scmp.lt.s32.totalorder %s1009_s29, %s1003_s27 }
  0x1c   : > { %v268_v24 = vand.u32 4294901760, %v197_v20 }
  0x1d   : > { %p1012_p3 = por %p1011_p2, %p1010_p1 }
  0x1e   : > { %v269_v25 = vsub.f32 %v197_v20, %v268_v24 }
  0x1f   : > { %p1013_p5 = pnand %p1012_p3, %p1006_p0 }
  0x20   : > { %v270_v31 = vand.u32 4294901760, %v269_v25 }
  0x22   : > { %876 = vmatmul.mubr.f32.vlgmr.msra.gmra.mrb[0].mxu0 %v270_v31  ;;  %v271_v32 = vsub.f32 %v269_v25, %v270_v31 }
  0x23   : > { %926 = vmatpush3.bf16.msra.mxu0 %v925_v26  ;;  %886 = vmatprep.mubr.msk.f32.mxu0 %vm1084_vm0, %v1085_v9 }
  0x24   : > { %v272_v37 = vand.u32 4294901760, %v271_v32  ;;  %927 = vmatprep.subr.bf16.mxu0 %v1083_v3 }
  0x26   : > { %843 = vmatmul.mubr.f32.vlgmr.msra.gmra.mrb[0].mxu1 %v272_v37 }
  0x27   : > { %908 = vmatpush3.bf16.msra.mxu1 %v907_v33  ;;  %929 = vmatpush3.bf16.msra.mxu0 %v928_v34 }
  0x28   : > { %909 = vmatprep.subr.bf16.mxu1 %v1083_v3  ;;  %930 = vmatprep.subr.bf16.mxu0 %v1083_v3 }
  0x29   : > { %853 = vmatprep.mubr.msk.f32.mxu1 %vm1084_vm0, %v1085_v9 }
  0x2a   : > { %887 = vmatmul.mubr.f32.vlgmr.msra.gmra.mrb[0].mxu0 %v268_v24 }
  0x2b   : > { %911 = vmatpush3.bf16.msra.mxu1 %v910_v38  ;;  %932 = vmatpush3.bf16.msra.mxu0 %v901_v10 }
  0x2c   : > { %912 = vmatprep.subr.bf16.mxu1 %v1083_v3  ;;  %933 = vmatprep.subr.bf16.mxu0 %v1083_v3 }
  0x2d   : > { %897 = vmatprep.mubr.msk.f32.mxu0 %vm1084_vm0, %v1085_v9 }
  0x2e   : > { %854 = vmatmul.mubr.f32.vlgmr.msra.gmra.mrb[0].mxu1 %v268_v24 }
  0x2f   : > { %914 = vmatpush3.bf16.msra.mxu1 %v913_v39  ;;  %935 = vmatpush3.bf16.msra.mxu0 %v904_v15 }
  0x30   : > { %915 = vmatprep.subr.bf16.mxu1 %v1083_v3  ;;  %864 = vmatprep.mubr.msk.f32.mxu1 %vm1084_vm0, %v1085_v9 }
  0x32   : > { %898 = vmatmul.mubr.f32.vlgmr.msra.gmra.mrb[0].mxu0 %v268_v24 }
  0x33   : > { %917 = vmatpush3.bf16.msra.mxu1 %v916_v40 }
  0x36   : > { %865 = vmatmul.mubr.f32.vlgmr.msra.gmra.mrb[0].mxu1 %v269_v25 }
 0x105   : > { %v680_v41 = vpop.f32.mrb[0].mxu0 }
 0x106   : > { %v899_v42 = vpop.f32.mrb[1].mxu0 }
 0x109   : > { %v445_v43 = vpop.f32.mrb[0].mxu1 }
 0x10a   : > { %v936_v44 = vadd.f32 %v680_v41, %v445_v43  ;;  %v866_v45 = vpop.f32.mrb[1].mxu1 }
 0x10c   : > { %685 = vst.msk [vmem:[%s178_s18] sm:$0xff] %vm684_vm2, %v936_v44 }
 0x10d   : > { %1016 = shalt.err (!%p1013_p5)
}
 0x10e   : > { %s1017_s30 = scalar_lea.hbm %s1203_s25, 128  ;;  %s1021_s5 = scalar_lea.hbm %s1252_s2, 256 }
 0x10f   : > { %p1018_p6 = scmp.ne.s32.totalorder %s1203_s25, %s1017_s30  ;;  %p1022_p10 = scmp.lt.u32.totalorder %s1203_s25, %s1252_s2 }
 0x110   : > { %p1023_p11 = scmp.lt.u32.totalorder %s1021_s5, %s1017_s30  ;;  %p1025_p13 = scmp.lt.u32.totalorder %s1017_s30, %s1203_s25 }
 0x111   : > { %p1019_p7 = pnand %p1018_p6, %p1142_p4 }
 0x112   : > { %p1024_p12 = por %p1023_p11, %p1022_p10 }
 0x113   : > { %p1020_p9 = pneg %p1019_p7 }
 0x114   : > { %p1026_p0 = por %p1025_p13, %p1024_p12 }
 0x116   : > { %p1027_p1 = pnand %p1026_p0, %p1020_p9 }
 0x118   : > { %1030 = shalt.err (!%p1027_p1)
}
 0x119   : > { %945 = dma.vmem_to_hbm [thread:$0]  (%p1142_p4), %s1205_s20, 128, %s1203_s25, %s687_s26  }
 0x11a PF: > { %p951_p2 = scmp.ge.s32.totalorder %s1081_s14, 2  ;;  %s714_s8 = sand.u32 1, %s1061_s9  }
 0x11b   : > { %s715_s15 = scalar_lea.sflag [#allocation3], %s714_s8 }
 0x11c   : > { %p948_p3 = pnand %p951_p2, %p1149_p8 }
 0x11e   : > { %1056 = dma.done.wait (!%p948_p3), %s715_s15, 128  }
 0x11f   : > { %1058 = vsyncadd (!%p948_p3), %s715_s15, 4294967168  ;;  %s15_s14 = sadd.s32 1, %s1081_s14   ;;  %s1255_s9 = smov %s1065_s10 }
 0x120   : > { %p12_p5 = scmp.ge.s32.totalorder %s15_s14, 4   ;;  %s1256_s10 = smov %s1069_s11 }
 0x121   : > { %s1257_s11 = smov %s1155_s22  ;;  %s1258_s12 = smov %s1077_s13 }
 0x122   : > { %s1259_s13 = smov %s1261_s17  ;;  %14 = sbr.rel (!%p12_p5) target bundleno = 4 (0x4), region = 66 }
 0x129   :  { %720 = vsyncpa [#allocation3], 1 }
 0x12a   :  { %722 = vsyncpa [#allocation3 + $0x1], 1 }

</bundles_post_ra>
